<compile_context>
chip_gen: v5e
topology: v5e:2x2
jax: 0.10.0
libtpu: 0.0.40
codegen_flags: <defaults>
</compile_context>

<pallas_src>
import functools

import jax
import jax.numpy as jnp
import numpy as np
from jax import lax
from jax.experimental import pallas as pl
from jax.experimental.pallas import tpu as pltpu


_VMEM_LIMIT = 48 * 1024 * 1024          # scoped VMEM cap, safe on v5e/v6e/v7x
_TARGET_BLOCK_BYTES = 4 * 1024 * 1024   # pass-1 logits tile target (~85% roofline)
_FAST_TABLE_BYTES = 6 * 1024 * 1024     # table-resident fast-path threshold
_FAST_ONEHOT_BYTES = 4 * 1024 * 1024    # (ts, V) one-hot / logits block cap


# ------------- Fused fast path: argmax + one-hot gather + pos add ------------

def _fused_kernel(x_ref, table_ref, pos_ref, o_ref):
    """Small-vocab fused forward for one (seq-tile, batch) grid step.

    x_ref:     (ts, V)  f32  logits
    table_ref: (V, D)        embedding table (VMEM resident, constant block)
    pos_ref:   (ts, D)       positional-embedding slice (resident across batch)
    o_ref:     (ts, D)       output block
    """
    x = x_ref[...]
    ts, V = x.shape
    mx = jnp.max(x, axis=-1, keepdims=True)                        # (ts, 1)
    iota_v = lax.broadcasted_iota(jnp.int32, (ts, V), 1)
    # first-occurrence tie break (matches torch.argmax)
    idx = jnp.min(jnp.where(x == mx, iota_v, V), axis=-1, keepdims=True)
    # TODO(synk): all-NaN logits rows diverge from torch.argmax (gather row 0).
    onehot = (iota_v == idx).astype(table_ref.dtype)               # (ts, V)
    emb = jnp.dot(onehot, table_ref[...],
                  preferred_element_type=jnp.float32)              # (ts, D)
    # dropout is identity (eval mode)
    o_ref[...] = (emb + pos_ref[...].astype(jnp.float32)).astype(o_ref.dtype)


# ----------------------------- Kernel A: argmax ------------------------------

def _argmax_kernel(x_ref, idx_ref, maxval_sc, argmax_sc):
    """Vocab-chunked argmax over the last axis of the logits.

    x_ref:      (ts, tv) f32  logits for one (batch, seq-tile, vocab-chunk)
    idx_ref:    (ts, 1)  i32  output indices (written on last vocab chunk)
    maxval_sc:  (ts, 1)  f32  running max     (VMEM scratch)
    argmax_sc:  (ts, 1)  i32  running argmax  (VMEM scratch)
    """
    v = pl.program_id(2)

    @pl.when(v == 0)
    def _init():
        maxval_sc[...] = jnp.full(maxval_sc.shape, -jnp.inf, dtype=maxval_sc.dtype)
        argmax_sc[...] = jnp.zeros(argmax_sc.shape, dtype=argmax_sc.dtype)

    x = x_ref[...]                                             # (ts, tv)
    ts, tv = x.shape

    # within-chunk argmax, first-occurrence tie-break (matches torch.argmax)
    chunk_max = jnp.max(x, axis=-1, keepdims=True)             # (ts, 1)
    iota_v = lax.broadcasted_iota(jnp.int32, (ts, tv), 1)      # (ts, tv)
    chunk_arg = jnp.min(jnp.where(x == chunk_max, iota_v, tv),
                        axis=-1, keepdims=True) + v * tv       # global index
    # TODO(synk): NaN logits diverge from torch.argmax (a NaN never wins here).

    # cross-chunk combine: strict > keeps the earliest chunk on exact ties.
    better = chunk_max > maxval_sc[...]
    argmax_sc[...] = jnp.where(better, chunk_arg, argmax_sc[...])
    maxval_sc[...] = jnp.where(better, chunk_max, maxval_sc[...])

    @pl.when(v == pl.num_programs(2) - 1)
    def _finalize():
        idx_ref[...] = argmax_sc[...]


# --------- Kernel B: double-buffered HBM row gather + pos-emb add ------------

def _gather_kernel(idx_ref, table_hbm, pos_ref, o_ref, row_buf, sems, *,
                   seq_tile):
    """Gather embedding rows from the HBM table (double-buffered) + pos add.

    idx_ref:   (B*S,)    i32  token ids in SMEM (scalar prefetch)
    table_hbm: (V, D)         embedding table left in HBM (memory_space=pl.ANY)
    pos_ref:   (ts, D)        positional-embedding slice for this seq tile
    o_ref:     (ts, D)        output block
    row_buf:   (2, ts, D)     double-buffered gather landing zone (VMEM)
    sems:      (2,)           one shared DMA semaphore per slot
    """
    s = pl.program_id(0)
    b = pl.program_id(1)
    n_s = pl.num_programs(0)
    n_b = pl.num_programs(1)
    seq_len = n_s * seq_tile
    t = s * n_b + b                       # linearized grid step (b innermost)
    total = n_s * n_b
    slot = t % 2

    def issue(tile_s, tile_b, dst_slot):
        base = tile_b * seq_len + tile_s * seq_tile
        for i in range(seq_tile):                       # static unroll
            tok = idx_ref[base + i]                     # scalar read from SMEM
            pltpu.make_async_copy(table_hbm.at[tok],
                                  row_buf.at[dst_slot, i],
                                  sems.at[dst_slot]).start()

    @pl.when(t == 0)
    def _prime():                                       # only exposed latency
        issue(s, b, slot)

    @pl.when(t + 1 < total)
    def _prefetch():                                    # overlaps with waits +
        b_nxt = b + 1                                   # compute + store below
        wrap = b_nxt == n_b
        b_nxt = jnp.where(wrap, 0, b_nxt)
        s_nxt = jnp.where(wrap, s + 1, s)
        issue(s_nxt, b_nxt, (t + 1) % 2)

    # Retire the current slot: each wait drains one row's worth of signal from
    # the shared per-slot semaphore; after seq_tile waits all rows have landed.
    for i in range(seq_tile):
        pltpu.make_async_copy(table_hbm.at[0], row_buf.at[slot, i],
                              sems.at[slot]).wait()

    emb = row_buf[slot].astype(jnp.float32)
    # dropout is identity (eval mode)
    o_ref[...] = (emb + pos_ref[...].astype(jnp.float32)).astype(o_ref.dtype)


# --------------------------------- Wrapper -----------------------------------

def _pick_tile(dim, candidates):
    for c in candidates:
        if c <= dim and dim % c == 0:
            return c
    return dim


@functools.partial(
    jax.jit,
    static_argnames=("seq_tile", "vocab_tile", "out_dtype", "force_two_pass"))
def token2embedding(index_weights, emb_table, pos_table, start_pos=0, *,
                    seq_tile=None, vocab_tile=None, out_dtype=jnp.float32,
                    force_two_pass=False):
    """index_weights: (B, S, V) f32; emb_table: (V, D); pos_table: (L, D)."""
    B, S, V = index_weights.shape
    Vt, D = emb_table.shape
    assert Vt == V
    itemsize = jnp.dtype(emb_table.dtype).itemsize

    # seq tile: multiple of 8 when possible.
    ts = _pick_tile(S, (128, 64, 32, 16, 8)) if seq_tile is None else seq_tile
    # v7x has 2 TensorCores: keep >= 2 parallel grid steps when we can.
    if B * (S // ts) < 2 and ts >= 16:
        ts = ts // 2
    assert S % ts == 0

    # glue: positional-embedding slice at start_pos.
    # TODO(synk): lax.dynamic_slice clamps OOB start_pos instead of erroring
    # like PyTorch indexing; callers must guarantee start_pos + S <= max_seq_len.
    pos_slice = lax.dynamic_slice(pos_table, (start_pos, 0), (S, D))

    table_bytes = V * D * itemsize
    use_fused = (not force_two_pass
                 and table_bytes <= _FAST_TABLE_BYTES
                 and ts * V * 4 <= _FAST_ONEHOT_BYTES)

    if use_fused:
        # ---- fused single pass: table + pos stay VMEM-resident ----
        return pl.pallas_call(
            _fused_kernel,
            out_shape=jax.ShapeDtypeStruct((B, S, D), out_dtype),
            grid_spec=pltpu.PrefetchScalarGridSpec(
                num_scalar_prefetch=0,
                grid=(S // ts, B),                     # batch innermost: pos &
                in_specs=[                             # table blocks unchanged
                    pl.BlockSpec((pl.Squeezed(), ts, V),
                                 lambda s, b: (b, s, 0)),
                    pl.BlockSpec((V, D), lambda s, b: (0, 0)),
                    pl.BlockSpec((ts, D), lambda s, b: (s, 0)),
                ],
                out_specs=pl.BlockSpec((pl.Squeezed(), ts, D),
                                       lambda s, b: (b, s, 0)),
            ),
            compiler_params=pltpu.CompilerParams(
                dimension_semantics=("parallel", "parallel"),
                vmem_limit_bytes=_VMEM_LIMIT),
        )(index_weights, emb_table, pos_slice)

    # ---- general path, pass 1: streaming argmax over the vocab axis ----
    # vocab chunk: lane-aligned, sized so the (ts, tv) f32 block is ~2-4 MiB
    # (Buffered(3) x 4 MiB = 12 MiB, fits v7x's 64 MiB VMEM with headroom).
    if vocab_tile is None:
        max_tv = max(128, _TARGET_BLOCK_BYTES // (ts * 4))
        cand = tuple(c for c in (8192, 4096, 2048, 1024, 512, 256, 128)
                     if c <= max_tv)
        tv = _pick_tile(V, cand)
    else:
        tv = vocab_tile
    assert V % tv == 0

    idx = pl.pallas_call(
        _argmax_kernel,
        out_shape=jax.ShapeDtypeStruct((B, S, 1), jnp.int32),
        grid_spec=pltpu.PrefetchScalarGridSpec(
            num_scalar_prefetch=0,
            grid=(B, S // ts, V // tv),
            in_specs=[
                pl.BlockSpec((pl.Squeezed(), ts, tv),
                             lambda b, s, v: (b, s, v),
                             pipeline_mode=pl.Buffered(3)),
            ],
            out_specs=pl.BlockSpec((pl.Squeezed(), ts, 1),
                                   lambda b, s, v: (b, s, 0)),
            scratch_shapes=[pltpu.VMEM((ts, 1), jnp.float32),
                            pltpu.VMEM((ts, 1), jnp.int32)],
        ),
        compiler_params=pltpu.CompilerParams(
            dimension_semantics=("parallel", "parallel", "arbitrary"),
            vmem_limit_bytes=_VMEM_LIMIT),
    )(index_weights)

    idx_flat = idx.reshape(B * S)
    # TODO(synk): B*S int32 in SMEM pads to the next pow2; prefetch per-batch
    # index slices instead for very long contexts (B*S in the 100K+ range).

    # ---- general path, pass 2: double-buffered DMA row gather + pos add ----
    out = pl.pallas_call(
        functools.partial(_gather_kernel, seq_tile=ts),
        out_shape=jax.ShapeDtypeStruct((B, S, D), out_dtype),
        grid_spec=pltpu.PrefetchScalarGridSpec(
            num_scalar_prefetch=1,                      # idx_flat -> SMEM
            grid=(S // ts, B),                          # batch innermost: pos
            in_specs=[                                  # block stays resident
                pl.BlockSpec(memory_space=pl.ANY),      # table stays in HBM
                pl.BlockSpec((ts, D), lambda s, b, idx: (s, 0)),
            ],
            out_specs=pl.BlockSpec((pl.Squeezed(), ts, D),
                                   lambda s, b, idx: (b, s, 0)),
            scratch_shapes=[pltpu.VMEM((2, ts, D), emb_table.dtype),
                            pltpu.SemaphoreType.DMA((2,))],
        ),
        compiler_params=pltpu.CompilerParams(
            # "arbitrary": cross-iteration row prefetch needs sequential grid
            # traversal (global step index drives priming / slot alternation).
            dimension_semantics=("arbitrary", "arbitrary"),
            vmem_limit_bytes=_VMEM_LIMIT),
    )(idx_flat, emb_table, pos_slice)

    return out


def _reference(index_weights, emb_table, pos_table, start_pos):
    idx = jnp.argmax(index_weights, axis=-1)                    # (B, S)
    emb = emb_table[idx]                                        # (B, S, D)
    S = index_weights.shape[1]
    pos = lax.dynamic_slice(pos_table, (start_pos, 0),
                            (S, pos_table.shape[1]))            # (S, D)
    return emb + pos[None, :, :]                                # dropout = id (eval)


if __name__ == "__main__":
    # small shapes consistent with the module
    B, S, V, D = 2, 8, 32, 32
    MAX_SEQ_LEN = 16
    START_POS = 2

    key = jax.random.PRNGKey(0)
    k_x, k_emb, k_pos = jax.random.split(key, 3)

    index_weights = jax.random.normal(k_x, (B, S, V), dtype=jnp.float32)
    emb_table = jax.random.normal(k_emb, (V, D), dtype=jnp.float32)   # nn.Embedding ~ N(0,1)
    pos_table = jax.random.normal(k_pos, (MAX_SEQ_LEN, D), dtype=jnp.float32) * 0.02

    ref = _reference(index_weights, emb_table, pos_table, START_POS)

    # fused small-table fast path (default for these shapes)
    out_fused = jax.block_until_ready(
        token2embedding(index_weights, emb_table, pos_table, START_POS))
    np.testing.assert_allclose(np.asarray(out_fused), np.asarray(ref),
                               rtol=1e-5, atol=1e-5)

    # general two-pass path: streaming argmax + double-buffered HBM row gather
    out_2p = jax.block_until_ready(
        token2embedding(index_weights, emb_table, pos_table, START_POS,
                        force_two_pass=True))
    np.testing.assert_allclose(np.asarray(out_2p), np.asarray(ref),
                               rtol=1e-5, atol=1e-5)

    print("KERNEL_OK")
</pallas_src>

<mosaic_0001>
module attributes {stable_mosaic.version = 11 : i64} {
  func.func @_fused_kernel(%arg0: i32, %arg1: i32, %arg2: memref<1x8x32xf32, #tpu.memory_space<vmem>>, %arg3: memref<32x32xf32, #tpu.memory_space<vmem>>, %arg4: memref<8x32xf32, #tpu.memory_space<vmem>>, %arg5: memref<1x8x32xf32, #tpu.memory_space<vmem>>) attributes {dimension_semantics = [#tpu.dimension_semantics<parallel>, #tpu.dimension_semantics<parallel>], iteration_bounds = array<i64: 1, 2>, scalar_prefetch = 0 : i64, scratch_operands = 0 : i64, tpu.core_type = #tpu.core_type<tc>, window_params = [{transform_indices = @transform_0, window_bounds = array<i64: 1, 8, 32>}, {pipeline_mode = #tpu.pipeline_mode<synchronous>, transform_indices = @transform_1, window_bounds = array<i64: 32, 32>}, {transform_indices = @transform_2, window_bounds = array<i64: 8, 32>}, {transform_indices = @transform_3, window_bounds = array<i64: 1, 8, 32>}]} {
    %c0 = arith.constant 0 : index
    %c0_0 = arith.constant 0 : index
    %c0_1 = arith.constant 0 : index
    %0 = vector.load %arg2[%c0, %c0_0, %c0_1] : memref<1x8x32xf32, #tpu.memory_space<vmem>>, vector<1x8x32xf32>
    %1 = vector.shape_cast %0 : vector<1x8x32xf32> to vector<8x32xf32>
    %cst = arith.constant dense<0xFF800000> : vector<8xf32>
    %2 = vector.multi_reduction <maximumf>, %1, %cst [1] : vector<8x32xf32> to vector<8xf32>
    %3 = vector.shape_cast %2 : vector<8xf32> to vector<8x1xf32>
    %4 = tpu.iota {dimensions = array<i32: 1>} : vector<8x32xi32>
    %5 = vector.broadcast %3 : vector<8x1xf32> to vector<8x32xf32>
    %6 = arith.cmpf oeq, %1, %5 : vector<8x32xf32>
    %c32_i32 = arith.constant 32 : i32
    %7 = vector.broadcast %c32_i32 : i32 to vector<8x32xi32>
    %8 = arith.select %6, %4, %7 : vector<8x32xi1>, vector<8x32xi32>
    %cst_2 = arith.constant dense<2147483647> : vector<8xi32>
    %9 = vector.multi_reduction <minsi>, %8, %cst_2 [1] : vector<8x32xi32> to vector<8xi32>
    %10 = vector.shape_cast %9 : vector<8xi32> to vector<8x1xi32>
    %11 = vector.broadcast %10 : vector<8x1xi32> to vector<8x32xi32>
    %12 = arith.cmpi eq, %4, %11 : vector<8x32xi32>
    %13 = arith.extui %12 : vector<8x32xi1> to vector<8x32xi32>
    %14 = arith.sitofp %13 : vector<8x32xi32> to vector<8x32xf32>
    %c0_3 = arith.constant 0 : index
    %c0_4 = arith.constant 0 : index
    %15 = vector.load %arg3[%c0_3, %c0_4] : memref<32x32xf32, #tpu.memory_space<vmem>>, vector<32x32xf32>
    %cst_5 = arith.constant dense<0.000000e+00> : vector<8x32xf32>
    %16 = tpu.matmul %14, %15, %cst_5 {dimension_numbers = #tpu.dot_dimension_numbers<[1], [0], [0], [1], [0, 0, 1, 1], [], []>} : vector<8x32xf32>, vector<32x32xf32>, vector<8x32xf32> -> vector<8x32xf32>
    %c0_6 = arith.constant 0 : index
    %c0_7 = arith.constant 0 : index
    %17 = vector.load %arg4[%c0_6, %c0_7] : memref<8x32xf32, #tpu.memory_space<vmem>>, vector<8x32xf32>
    %18 = arith.addf %16, %17 : vector<8x32xf32>
    %c0_8 = arith.constant 0 : index
    %c0_9 = arith.constant 0 : index
    %c0_10 = arith.constant 0 : index
    %19 = vector.load %arg5[%c0_8, %c0_9, %c0_10] : memref<1x8x32xf32, #tpu.memory_space<vmem>>, vector<1x8x32xf32>
    %20 = vector.shape_cast %19 : vector<1x8x32xf32> to vector<8x32xf32>
    %21 = vector.shape_cast %18 : vector<8x32xf32> to vector<1x8x32xf32>
    tpu.vector_store %arg5[%c0_8, %c0_9, %c0_10], %21 {strides = array<i32>} : memref<1x8x32xf32, #tpu.memory_space<vmem>>, vector<1x8x32xf32>,
    return
  }
  func.func @transform_0(%arg0: i32, %arg1: i32) -> (i32, i32, i32) {
    %c0_i32 = arith.constant 0 : i32
    %c0_i32_0 = arith.constant 0 : i32
    return %arg1, %arg0, %c0_i32 : i32, i32, i32
  }
  func.func @transform_1(%arg0: i32, %arg1: i32) -> (i32, i32) {
    %c0_i32 = arith.constant 0 : i32
    %c0_i32_0 = arith.constant 0 : i32
    %c0_i32_1 = arith.constant 0 : i32
    return %c0_i32, %c0_i32_0 : i32, i32
  }
  func.func @transform_2(%arg0: i32, %arg1: i32) -> (i32, i32) {
    %c0_i32 = arith.constant 0 : i32
    %c0_i32_0 = arith.constant 0 : i32
    return %arg0, %c0_i32 : i32, i32
  }
  func.func @transform_3(%arg0: i32, %arg1: i32) -> (i32, i32, i32) {
    %c0_i32 = arith.constant 0 : i32
    %c0_i32_0 = arith.constant 0 : i32
    return %arg1, %arg0, %c0_i32 : i32, i32, i32
  }
}

</mosaic_0001>

<bundles_post_ra>
// kernel: token2embedding.1
= control target key start
LH: loop header
LB: loop body
LE: loop exit
PB: predicated region body
PF: predicated region fallthrough
CT: control target
= control target key end

     0   :  { %8 = vsyncpa [#allocation3], 0  ;;  %s726_s0 = inlined_call_operand.vmem [shape: f32[2,8,32], index: 0, kind: input, shape index: {}]   ;;  %s727_s1 = inlined_call_operand.hbm [shape: f32[32,32], index: 1, kind: input, shape index: {}]   ;;  %s728_s2 = inlined_call_operand.vmem [shape: f32[8,32], index: 2, kind: input, shape index: {}]   ;;  %s729_s3 = inlined_call_operand.hbm [shape: f32[2,8,32], index: 3, kind: output, shape index: {}]  }
   0x1   :  { %9 = vsyncpa [#allocation4], 0 }
   0x2   :  { %11 = vsyncpa [#allocation4 + $0x1], 0  ;;  %s619_s12 = smov 0   ;;  %s621_s13 = smov 0  }
   0x3   :  { %s623_s14 = smov 0   ;;  %s625_s15 = smov 0  }
   0x4   :  { %s627_s16 = smov 0   ;;  %s629_s17 = smov 0  }
   0x5 LB: > { %s396_s18 = sadd.s32 4294967295, %s593_s17   ;;  %s397_s19 = sadd.s32 4294967294, %s593_s17   ;;  %s593_s17 = sphi %s629_s17, %s17_s17   ;;  %s589_s16 = sphi %s627_s16, %s736_s16   ;;  %s585_s15 = sphi %s625_s15, %s735_s15   ;;  %s581_s14 = sphi %s623_s14, %s734_s14   ;;  %s577_s13 = sphi %s621_s13, %s733_s13   ;;  %s573_s12 = sphi %s619_s12, %s732_s12  }
   0x6   : > { %s26_s20 = sadd.s32 1, %s589_s16  ;;  %s113_s21 = sadd.s32 1, %s581_s14 }
   0x7   : > { %p27_p0 = scmp.ge.s32.totalorder %s26_s20, 2  ;;  %p123_p1 = scmp.ne.s32.totalorder %s581_s14, %s577_s13 }
   0x8   : > { %p124_p2 = scmp.eq.s32.totalorder %s396_s18, 1  ;;  %p129_p3 = scmp.ne.s32.totalorder %s577_s13, %s573_s12 }
   0x9   : > { %s738_s20 = smov (%p27_p0, %s26_s20), 0  ;;  %p130_p5 = scmp.eq.s32.totalorder %s397_s19, 1 }
   0xa   : > { %p659_p4 = por %p124_p2, %p123_p1  ;;  %s108_s23 = ssub.s32 %s589_s16, %s738_s20 }
   0xb   : > { %p398_p6 = scmp.ge.s32.totalorder %s593_s17, 1  ;;  %p111_p7 = scmp.eq.s32.totalorder %s108_s23, 0 }
   0xc   : > { %p666_p8 = por %p130_p5, %p129_p3  ;;  %p137_p9 = scmp.lt.s32.totalorder %s593_s17, 3 }
   0xd   : > { %s672_s25 = scalar_select %p111_p7, %s581_s14, %s113_s21  }
   0xe   : > { %p138_p10 = pnand %p398_p6, %p137_p9  ;;  %p426_p11 = scmp.eq.s32.totalorder %s396_s18, 0 }
   0xf   : > { %s148_s28 = sshll.u32 %s727_s1, 4  ;;  %s595_s29 = smov [#allocation2]   ;;  %s149_s28 = int_to_ptr.hbm [resolvable:$true] %s148_s28 }
  0x10   : > { %p418_p12 = pneg %p138_p10  ;;  %s150_s30 = sshll.u32 %s595_s29, 4  ;;  %s151_s30 = int_to_ptr.vmem [resolvable:$true] %s150_s30 }
  0x11   : > { %s596_s4 = smov 128   ;;  %s597_s5 = smov 8  }
  0x12   : > { %p419_p13 = pnand %p426_p11, %p418_p12  ;;  %183 = sbr.rel (%p138_p10) target bundleno = 526 (0x20e), region = 32 }
  0x14   : > { %421 = dma.hbm_to_vmem [thread:$0]  (!%p419_p13), %s149_s28, 512, %s151_s30, [#allocation3], %s596_s4, %s596_s4, %s597_s5  }
  0x17   : > { %564 = dma.done.wait (%p426_p11), [#allocation3], 512  }
  0x18   : > { %566 = vsyncadd (%p426_p11), [#allocation3], 4294966784  ;;  %p214_p0 = scmp.lt.s32.totalorder %s585_s15, 1  ;;  %vm226_vm0 = vcmask 261120   ;;  %v230_v2 = vlaneseq  ;;  %v255_v9 = vld [vmem:[#allocation2 + $0x18] sm:$0xff]  ;;  %v254_v14 = vld [vmem:[#allocation2 + $0x10] sm:$0xff] }
  0x19   : > { %272 = vmatpush.msra.mxu0 %v255_v9  ;;  %v253_v15 = vld [vmem:[#allocation2 + $0x8] sm:$0xff]  ;;  %v252_v16 = vld [vmem:[#allocation2] sm:$0xff]  ;;  %v598_v22 = vmov 0.0   ;;  %s211_s11 = sand.u32 1, %s577_s13   ;;  %s409_s19 = sshll.u32 %s585_s15, 3 }
  0x1a   : > { %s215_s6 = scalar_select %p214_p0, %s585_s15, 1  ;;  %v231_v3 = vand.u32 127, %v230_v2  ;;  %v256_v24 = vld [vmem:[%s728_s2] sm:$0xff] }
  0x1b   : > { %273 = vmatpush.msra.mxu0 %v254_v14  ;;  %s404_s18 = sshll.u32 %s211_s11, 3  ;;  %s293_s26 = scalar_lea.hbm %s729_s3, %s409_s19 }
  0x1c   : > { %s405_s7 = sshll.u32 %s215_s6, 3  ;;  %s213_s29 = scalar_lea.vmem [#allocation5], %s404_s18 }
  0x1d   : > { %s220_s10 = scalar_lea.vmem %s726_s0, %s405_s7  ;;  %274 = vmatpush.msra.mxu0 %v253_v15  ;;  %s295_s30 = sshll.u32 %s213_s29, 4  ;;  %s296_s30 = int_to_ptr.vmem [resolvable:$true] %s295_s30 }
  0x1e   : > { %v225_v0 = vld [vmem:[%s220_s10] sm:$0xff]  ;;  %s297_s4 = sshll.u32 %s293_s26, 4  ;;  %s282_s5 = scalar_lea.sflag [#allocation4], %s211_s11  ;;  %s298_s4 = int_to_ptr.hbm [resolvable:$true] %s297_s4 }
  0x1f   : > { %v227_v1 = vsel %vm226_vm0, %v225_v0, -inf  ;;  %275 = vmatpush.msra.mxu0 %v252_v16  ;;  %s525_s15 = sshra.s32 %s298_s4, 4  ;;  %s531_s9 = scalar_lea.hbm %s729_s3, 16  ;;  %s526_s15 = int_to_ptr.hbm [resolvable:$true] %s525_s15 }
  0x20   : > { %228 = vmax.xlane.f32.xlu0 %v227_v1  ;;  %s527_s6 = scalar_lea.hbm %s526_s15, 8  ;;  %p532_p5 = scmp.lt.s32.totalorder %s526_s15, %s729_s3 }
  0x21   : > { %p528_p1 = scmp.ne.s32.totalorder %s526_s15, %s527_s6  ;;  %p533_p6 = scmp.lt.s32.totalorder %s531_s9, %s527_s6 }
  0x23   : > { %p529_p2 = pnand %p528_p1, %p659_p4  ;;  %p534_p7 = por %p533_p6, %p532_p5 }
  0x25   : > { %p530_p3 = pneg %p529_p2 }
  0x27   : > { %p535_p9 = pnand %p534_p7, %p530_p3 }
  0x93   : > { %v229_v4 = vpop.xlane.xlu0 %228 }
  0x94   : > { %vm232_vm1 = vcmp.eq.f32.partialorder %v225_v0, %v229_v4 }
  0x95   : > { %v233_v5 = vsel %vm232_vm1, %v231_v3, 32 }
  0x96   : > { %v234_v6 = vsel %vm226_vm0, %v233_v5, 2147483647 }
  0x97   : > { %v236_v7 = vshra.s32 %v234_v6, 16  ;;  %v235_v10 = vand.u32 65535, %v234_v6 }
  0x99   : > { %v238_v8 = vcvt.s32.f32 %v236_v7  ;;  %v237_v12 = vcvt.s32.f32 %v235_v10 }
  0x9b   : > { %239 = vmin.xlane.f32.xlu0 %v238_v8 }
 0x10e   : > { %v240_v11 = vpop.xlane.xlu0 %239 }
 0x10f   : > { %vm241_vm2 = vcmp.eq.f32.partialorder %v238_v8, %v240_v11  ;;  %v246_v17 = vcvt.f32.s32 %v240_v11 }
 0x110   : > { %v242_v13 = vsel %vm241_vm2, %v237_v12, inf }
 0x111   : > { %243 = vmin.xlane.f32.xlu1 %v242_v13  ;;  %v247_v19 = vshll.u32 %v246_v17, 16 }
 0x184   : > { %v244_v18 = vpop.xlane.xlu1 %243 }
 0x185   : > { %v245_v20 = vcvt.f32.s32 %v244_v18 }
 0x187   : > { %v248_v21 = vadd.s32 %v247_v19, %v245_v20 }
 0x189   : > { %vm249_vm3 = vcmp.eq.s32.totalorder %v231_v3, %v248_v21 }
 0x18a   : > { %v406_v23 = vsel %vm249_vm3, 1.0, %v598_v22 }
 0x18b   : > { %407 = vmatmul.msk.f32.vlgmr.msra.gmra.mxu0 %vm226_vm0, %v406_v23 }
 0x208   : > { %v277_v25 = vpop.f32.mrf.mxu0 }
 0x209   : > { %v278_v26 = vadd.f32 %v277_v25, %v256_v24 }
 0x20b   : > { %280 = vst.msk [vmem:[%s213_s29] sm:$0xff] %vm226_vm0, %v278_v26 }
 0x20c   : > { %538 = shalt.err (!%p535_p9)
}
 0x20d   : > { %416 = dma.vmem_to_hbm [thread:$0]  (%p659_p4), %s296_s30, 128, %s298_s4, %s282_s5  }
 0x20e PF: > { %p428_p10 = scmp.ge.s32.totalorder %s593_s17, 2  ;;  %s309_s11 = sand.u32 1, %s573_s12  }
 0x20f   : > { %s310_s19 = scalar_lea.sflag [#allocation4], %s309_s11 }
 0x210   : > { %p423_p11 = pnand %p428_p10, %p666_p8 }
 0x212   : > { %p424_p12 = pneg %p423_p11 }
 0x214   : > { %568 = dma.done.wait (%p424_p12), %s310_s19, 128  }
 0x215   : > { %570 = vsyncadd (%p424_p12), %s310_s19, 4294967168  ;;  %s17_s17 = sadd.s32 1, %s593_s17   ;;  %s732_s12 = smov %s577_s13 }
 0x216   : > { %p14_p13 = scmp.ge.s32.totalorder %s17_s17, 4   ;;  %s733_s13 = smov %s581_s14 }
 0x217   : > { %s734_s14 = smov %s672_s25  ;;  %s735_s15 = smov %s589_s16 }
 0x218   : > { %s736_s16 = smov %s738_s20  ;;  %16 = sbr.rel (!%p14_p13) target bundleno = 5 (0x5), region = 75 }
 0x21d   :  { %316 = vsyncpa [#allocation3], 1 }
 0x21e   :  { %318 = vsyncpa [#allocation3 + $0x1], 1 }
 0x21f   :  { %319 = vsyncpa [#allocation4], 1 }
 0x220   :  { %321 = vsyncpa [#allocation4 + $0x1], 1 }

</bundles_post_ra>
